<compile_context>
chip_gen: v7x
topology: tpu7x:2x2x1
jax: 0.10.0
libtpu: 0.0.40
codegen_flags: <defaults>
</compile_context>

<pallas_src>
import functools

import jax
import jax.numpy as jnp
from jax.experimental import pallas as pl
from jax.experimental.pallas import tpu as pltpu


def _reorg_xla(x, s):
    # TODO(synk): integer / f64 inputs have no exact MXU-based lane
    # de-interleave; fall back to a single fused XLA relayout pass.
    B, C, H, W = x.shape
    return (
        x.reshape(B, C, H // s, s, W // s, s)
        .transpose(0, 3, 5, 1, 2, 4)
        .reshape(B, s * s * C, H // s, W // s)
    )


def _round_up(n, m):
    return -(-n // m) * m


def _pick_row_block(rows, row_vmem_bytes, pack, batch, budget_bytes):
    """Pick the row-block size R (rows of the merged C*Hout axis) per grid step.

    R is pack-aligned (or the full extent for tiny inputs), fits the combined
    padded in+out VMEM budget, and leaves >=4 grid steps when possible so both
    TensorCores and the DMA pipeline are used even at batch 1.
    """
    if rows <= pack:
        return rows
    r = max(pack, (budget_bytes // max(row_vmem_bytes, 1)) // pack * pack)
    r = min(r, (rows // pack) * pack)
    while batch * (-(-rows // r)) < 4 and r > pack:
        r = max(pack, (r // 2) // pack * pack)
    return r


def _reorg_kernel(x_ref, o_ref, *, hs, ws, W, Wout, split_f32):
    # x_ref : (R, hs*W)            lane-dense slab of the NCHW input view
    # o_ref : (hs, ws, R, Wout)    lane-dense slabs of the NCHW output view
    #
    # 0/1 lane-selection matrices: sel[wi][w, j] = 1  iff  w == ws*j + wi.
    w_ids = jax.lax.broadcasted_iota(jnp.int32, (W, Wout), 0)
    j_ids = jax.lax.broadcasted_iota(jnp.int32, (W, Wout), 1)
    sels = [(w_ids == ws * j_ids + wi).astype(jnp.bfloat16) for wi in range(ws)]

    for hi in range(hs):
        # contiguous lane slice: rows h = hs*i + hi for every (c, i) row r.
        xs = x_ref[:, pl.ds(hi * W, W)]                      # (R, W)
        if split_f32:
            # exact 3-way bf16 split: x = hi + mid + lo (24 mantissa bits)
            xf = xs.astype(jnp.float32)
            p_hi = xf.astype(jnp.bfloat16)
            rem = xf - p_hi.astype(jnp.float32)
            p_mid = rem.astype(jnp.bfloat16)
            p_lo = (rem - p_mid.astype(jnp.float32)).astype(jnp.bfloat16)
            parts = (p_hi, p_mid, p_lo)
        else:
            parts = (xs,)                                    # bf16: exact as-is

        for wi in range(ws):
            acc = jnp.dot(parts[0], sels[wi], preferred_element_type=jnp.float32)
            for p in parts[1:]:
                acc = acc + jnp.dot(p, sels[wi], preferred_element_type=jnp.float32)
            o_ref[hi, wi] = acc.astype(o_ref.dtype)          # (R, Wout) slab store


def reorg(x, stride=2):
    """Pallas TPU Reorg: (B, C, H, W) -> (B, stride*stride*C, H//stride, W//stride)."""
    assert x.ndim == 4
    B, C, H, W = x.shape
    assert H % stride == 0 and W % stride == 0
    if stride == 1:
        return x

    hs = ws = stride
    Hout, Wout = H // hs, W // ws

    dt = jnp.dtype(x.dtype)
    if dt == jnp.bfloat16:
        split_f32 = False
    elif dt in (jnp.dtype(jnp.float32), jnp.dtype(jnp.float16)):
        split_f32 = True
    else:
        return _reorg_xla(x, stride)

    rows = C * Hout                   # merged (c, i) row axis, identical on in/out
    lane_in = hs * W                  # input view lane width
    itemsize = dt.itemsize
    pack = max(8, 32 // itemsize)     # sublane alignment: f32 -> 8, bf16 -> 16

    # padded per-row VMEM footprint of one input + one output block
    row_vmem = (_round_up(lane_in, 128) + hs * ws * _round_up(Wout, 128)) * itemsize

    try:
        info = pltpu.get_tpu_info()
        vmem_cap = int(getattr(info, "vmem_capacity_bytes", 64 * 1024 * 1024))
    except Exception:
        vmem_cap = 64 * 1024 * 1024
    budget = max(2 << 20, min(8 << 20, vmem_cap // 16))      # combined in+out per step
    vmem_limit = int(min(vmem_cap * 3 // 4, 96 << 20))

    R = _pick_row_block(rows, row_vmem, pack, B, budget)
    grid = (B, pl.cdiv(rows, R))

    # Free (metadata-only) views: no HBM relayout on either side of the kernel.
    xin = x.reshape(B, rows, lane_in)

    kernel = functools.partial(
        _reorg_kernel, hs=hs, ws=ws, W=W, Wout=Wout, split_f32=split_f32
    )
    y = pl.pallas_call(
        kernel,
        out_shape=jax.ShapeDtypeStruct((B, hs, ws, rows, Wout), x.dtype),
        grid=grid,
        in_specs=[pl.BlockSpec((None, R, lane_in), lambda b, m: (b, m, 0))],
        out_specs=pl.BlockSpec(
            (None, hs, ws, R, Wout), lambda b, m: (b, 0, 0, m, 0)
        ),
        compiler_params=pltpu.CompilerParams(
            dimension_semantics=("parallel", "parallel"),
            vmem_limit_bytes=vmem_limit,
        ),
    )(xin)

    # Pure metadata reshape: (B, hs, ws, C*Hout, Wout) -> (B, hs*ws*C, Hout, Wout)
    return y.reshape(B, hs * ws * C, Hout, Wout)


if __name__ == "__main__":
    # Reorg has no learnable parameters; nothing to initialize.
    def _reference(x, s):
        # Mirrors the PyTorch Reorg view/transpose chain exactly:
        # out[b, (hi*s+wi)*C + c, i, j] = x[b, c, s*i+hi, s*j+wi]
        B, C, H, W = x.shape
        return (
            x.reshape(B, C, H // s, s, W // s, s)
            .transpose(0, 3, 5, 1, 2, 4)
            .reshape(B, s * s * C, H // s, W // s)
        )

    k0, k1, k2 = jax.random.split(jax.random.PRNGKey(0), 3)

    # Primary small test (toy shape from the spec).
    x = jax.random.normal(k0, (2, 4, 16, 16), dtype=jnp.float32)
    y = jax.block_until_ready(reorg(x, stride=2))
    assert y.shape == (2, 16, 8, 8) and y.dtype == x.dtype
    assert jnp.array_equal(y, _reference(x, 2)), "mismatch (f32, stride 2)"

    # Real-YOLO-like channel count, bf16 (exercises the direct bf16 MXU path).
    x2 = jax.random.normal(k1, (1, 64, 32, 32), dtype=jnp.bfloat16)
    y2 = jax.block_until_ready(reorg(x2, stride=2))
    assert jnp.array_equal(y2, _reference(x2, 2)), "mismatch (bf16, stride 2)"

    # Non-default stride.
    x3 = jax.random.normal(k2, (1, 2, 16, 16), dtype=jnp.float32)
    y3 = jax.block_until_ready(reorg(x3, stride=4))
    assert jnp.array_equal(y3, _reference(x3, 4)), "mismatch (f32, stride 4)"

    print("KERNEL_OK")
</pallas_src>

<mosaic_0001>
module attributes {stable_mosaic.version = 11 : i64} {
  func.func @_reorg_kernel(%arg0: i32, %arg1: i32, %arg2: memref<1x16x32xf32, #tpu.memory_space<vmem>>, %arg3: memref<1x2x2x16x8xf32, #tpu.memory_space<vmem>>) attributes {dimension_semantics = [#tpu.dimension_semantics<parallel>, #tpu.dimension_semantics<parallel>], iteration_bounds = array<i64: 2, 2>, scalar_prefetch = 0 : i64, scratch_operands = 0 : i64, tpu.core_type = #tpu.core_type<tc>, window_params = [{transform_indices = @transform_0, window_bounds = array<i64: 1, 16, 32>}, {transform_indices = @transform_1, window_bounds = array<i64: 1, 2, 2, 16, 8>}]} {
    %0 = tpu.iota {dimensions = array<i32: 0>} : vector<16x8xi32>
    %1 = tpu.iota {dimensions = array<i32: 1>} : vector<16x8xi32>
    %c2_i32 = arith.constant 2 : i32
    %2 = vector.broadcast %c2_i32 : i32 to vector<16x8xi32>
    %3 = arith.muli %2, %1 : vector<16x8xi32>
    %c0_i32 = arith.constant 0 : i32
    %4 = vector.broadcast %c0_i32 : i32 to vector<16x8xi32>
    %5 = arith.addi %3, %4 : vector<16x8xi32>
    %6 = arith.cmpi eq, %0, %5 : vector<16x8xi32>
    %7 = arith.extui %6 : vector<16x8xi1> to vector<16x8xi32>
    %8 = arith.sitofp %7 : vector<16x8xi32> to vector<16x8xf32>
    %9 = arith.truncf %8 : vector<16x8xf32> to vector<16x8xbf16>
    %c2_i32_0 = arith.constant 2 : i32
    %10 = vector.broadcast %c2_i32_0 : i32 to vector<16x8xi32>
    %11 = arith.muli %10, %1 : vector<16x8xi32>
    %c1_i32 = arith.constant 1 : i32
    %12 = vector.broadcast %c1_i32 : i32 to vector<16x8xi32>
    %13 = arith.addi %11, %12 : vector<16x8xi32>
    %14 = arith.cmpi eq, %0, %13 : vector<16x8xi32>
    %15 = arith.extui %14 : vector<16x8xi1> to vector<16x8xi32>
    %16 = arith.sitofp %15 : vector<16x8xi32> to vector<16x8xf32>
    %17 = arith.truncf %16 : vector<16x8xf32> to vector<16x8xbf16>
    %c0 = arith.constant 0 : index
    %c0_1 = arith.constant 0 : index
    %c0_2 = arith.constant 0 : index
    %18 = vector.load %arg2[%c0, %c0_1, %c0_2] : memref<1x16x32xf32, #tpu.memory_space<vmem>>, vector<1x16x16xf32>
    %19 = vector.shape_cast %18 : vector<1x16x16xf32> to vector<16x16xf32>
    %20 = arith.truncf %19 : vector<16x16xf32> to vector<16x16xbf16>
    %21 = arith.extf %20 : vector<16x16xbf16> to vector<16x16xf32>
    %22 = arith.subf %19, %21 : vector<16x16xf32>
    %23 = arith.truncf %22 : vector<16x16xf32> to vector<16x16xbf16>
    %24 = arith.extf %23 : vector<16x16xbf16> to vector<16x16xf32>
    %25 = arith.subf %22, %24 : vector<16x16xf32>
    %26 = arith.truncf %25 : vector<16x16xf32> to vector<16x16xbf16>
    %cst = arith.constant dense<0.000000e+00> : vector<16x8xf32>
    %27 = tpu.matmul %20, %9, %cst {dimension_numbers = #tpu.dot_dimension_numbers<[1], [0], [0], [1], [0, 0, 1, 1], [], []>} : vector<16x16xbf16>, vector<16x8xbf16>, vector<16x8xf32> -> vector<16x8xf32>
    %cst_3 = arith.constant dense<0.000000e+00> : vector<16x8xf32>
    %28 = tpu.matmul %23, %9, %cst_3 {dimension_numbers = #tpu.dot_dimension_numbers<[1], [0], [0], [1], [0, 0, 1, 1], [], []>} : vector<16x16xbf16>, vector<16x8xbf16>, vector<16x8xf32> -> vector<16x8xf32>
    %29 = arith.addf %27, %28 : vector<16x8xf32>
    %cst_4 = arith.constant dense<0.000000e+00> : vector<16x8xf32>
    %30 = tpu.matmul %26, %9, %cst_4 {dimension_numbers = #tpu.dot_dimension_numbers<[1], [0], [0], [1], [0, 0, 1, 1], [], []>} : vector<16x16xbf16>, vector<16x8xbf16>, vector<16x8xf32> -> vector<16x8xf32>
    %31 = arith.addf %29, %30 : vector<16x8xf32>
    %c0_5 = arith.constant 0 : index
    %c0_6 = arith.constant 0 : index
    %c0_7 = arith.constant 0 : index
    %c0_8 = arith.constant 0 : index
    %c0_9 = arith.constant 0 : index
    %32 = vector.load %arg3[%c0_5, %c0_6, %c0_7, %c0_8, %c0_9] : memref<1x2x2x16x8xf32, #tpu.memory_space<vmem>>, vector<1x1x1x16x8xf32>
    %33 = vector.shape_cast %32 : vector<1x1x1x16x8xf32> to vector<16x8xf32>
    %34 = vector.shape_cast %31 : vector<16x8xf32> to vector<1x1x1x16x8xf32>
    tpu.vector_store %arg3[%c0_5, %c0_6, %c0_7, %c0_8, %c0_9], %34 {strides = array<i32>} : memref<1x2x2x16x8xf32, #tpu.memory_space<vmem>>, vector<1x1x1x16x8xf32>,
    %cst_10 = arith.constant dense<0.000000e+00> : vector<16x8xf32>
    %35 = tpu.matmul %20, %17, %cst_10 {dimension_numbers = #tpu.dot_dimension_numbers<[1], [0], [0], [1], [0, 0, 1, 1], [], []>} : vector<16x16xbf16>, vector<16x8xbf16>, vector<16x8xf32> -> vector<16x8xf32>
    %cst_11 = arith.constant dense<0.000000e+00> : vector<16x8xf32>
    %36 = tpu.matmul %23, %17, %cst_11 {dimension_numbers = #tpu.dot_dimension_numbers<[1], [0], [0], [1], [0, 0, 1, 1], [], []>} : vector<16x16xbf16>, vector<16x8xbf16>, vector<16x8xf32> -> vector<16x8xf32>
    %37 = arith.addf %35, %36 : vector<16x8xf32>
    %cst_12 = arith.constant dense<0.000000e+00> : vector<16x8xf32>
    %38 = tpu.matmul %26, %17, %cst_12 {dimension_numbers = #tpu.dot_dimension_numbers<[1], [0], [0], [1], [0, 0, 1, 1], [], []>} : vector<16x16xbf16>, vector<16x8xbf16>, vector<16x8xf32> -> vector<16x8xf32>
    %39 = arith.addf %37, %38 : vector<16x8xf32>
    %c0_13 = arith.constant 0 : index
    %c0_14 = arith.constant 0 : index
    %c1 = arith.constant 1 : index
    %c0_15 = arith.constant 0 : index
    %c0_16 = arith.constant 0 : index
    %40 = vector.load %arg3[%c0_13, %c0_14, %c1, %c0_15, %c0_16] : memref<1x2x2x16x8xf32, #tpu.memory_space<vmem>>, vector<1x1x1x16x8xf32>
    %41 = vector.shape_cast %40 : vector<1x1x1x16x8xf32> to vector<16x8xf32>
    %42 = vector.shape_cast %39 : vector<16x8xf32> to vector<1x1x1x16x8xf32>
    tpu.vector_store %arg3[%c0_13, %c0_14, %c1, %c0_15, %c0_16], %42 {strides = array<i32>} : memref<1x2x2x16x8xf32, #tpu.memory_space<vmem>>, vector<1x1x1x16x8xf32>,
    %c0_17 = arith.constant 0 : index
    %c0_18 = arith.constant 0 : index
    %c16 = arith.constant 16 : index
    %43 = vector.load %arg2[%c0_17, %c0_18, %c16] : memref<1x16x32xf32, #tpu.memory_space<vmem>>, vector<1x16x16xf32>
    %44 = vector.shape_cast %43 : vector<1x16x16xf32> to vector<16x16xf32>
    %45 = arith.truncf %44 : vector<16x16xf32> to vector<16x16xbf16>
    %46 = arith.extf %45 : vector<16x16xbf16> to vector<16x16xf32>
    %47 = arith.subf %44, %46 : vector<16x16xf32>
    %48 = arith.truncf %47 : vector<16x16xf32> to vector<16x16xbf16>
    %49 = arith.extf %48 : vector<16x16xbf16> to vector<16x16xf32>
    %50 = arith.subf %47, %49 : vector<16x16xf32>
    %51 = arith.truncf %50 : vector<16x16xf32> to vector<16x16xbf16>
    %cst_19 = arith.constant dense<0.000000e+00> : vector<16x8xf32>
    %52 = tpu.matmul %45, %9, %cst_19 {dimension_numbers = #tpu.dot_dimension_numbers<[1], [0], [0], [1], [0, 0, 1, 1], [], []>} : vector<16x16xbf16>, vector<16x8xbf16>, vector<16x8xf32> -> vector<16x8xf32>
    %cst_20 = arith.constant dense<0.000000e+00> : vector<16x8xf32>
    %53 = tpu.matmul %48, %9, %cst_20 {dimension_numbers = #tpu.dot_dimension_numbers<[1], [0], [0], [1], [0, 0, 1, 1], [], []>} : vector<16x16xbf16>, vector<16x8xbf16>, vector<16x8xf32> -> vector<16x8xf32>
    %54 = arith.addf %52, %53 : vector<16x8xf32>
    %cst_21 = arith.constant dense<0.000000e+00> : vector<16x8xf32>
    %55 = tpu.matmul %51, %9, %cst_21 {dimension_numbers = #tpu.dot_dimension_numbers<[1], [0], [0], [1], [0, 0, 1, 1], [], []>} : vector<16x16xbf16>, vector<16x8xbf16>, vector<16x8xf32> -> vector<16x8xf32>
    %56 = arith.addf %54, %55 : vector<16x8xf32>
    %c0_22 = arith.constant 0 : index
    %c1_23 = arith.constant 1 : index
    %c0_24 = arith.constant 0 : index
    %c0_25 = arith.constant 0 : index
    %c0_26 = arith.constant 0 : index
    %57 = vector.load %arg3[%c0_22, %c1_23, %c0_24, %c0_25, %c0_26] : memref<1x2x2x16x8xf32, #tpu.memory_space<vmem>>, vector<1x1x1x16x8xf32>
    %58 = vector.shape_cast %57 : vector<1x1x1x16x8xf32> to vector<16x8xf32>
    %59 = vector.shape_cast %56 : vector<16x8xf32> to vector<1x1x1x16x8xf32>
    tpu.vector_store %arg3[%c0_22, %c1_23, %c0_24, %c0_25, %c0_26], %59 {strides = array<i32>} : memref<1x2x2x16x8xf32, #tpu.memory_space<vmem>>, vector<1x1x1x16x8xf32>,
    %cst_27 = arith.constant dense<0.000000e+00> : vector<16x8xf32>
    %60 = tpu.matmul %45, %17, %cst_27 {dimension_numbers = #tpu.dot_dimension_numbers<[1], [0], [0], [1], [0, 0, 1, 1], [], []>} : vector<16x16xbf16>, vector<16x8xbf16>, vector<16x8xf32> -> vector<16x8xf32>
    %cst_28 = arith.constant dense<0.000000e+00> : vector<16x8xf32>
    %61 = tpu.matmul %48, %17, %cst_28 {dimension_numbers = #tpu.dot_dimension_numbers<[1], [0], [0], [1], [0, 0, 1, 1], [], []>} : vector<16x16xbf16>, vector<16x8xbf16>, vector<16x8xf32> -> vector<16x8xf32>
    %62 = arith.addf %60, %61 : vector<16x8xf32>
    %cst_29 = arith.constant dense<0.000000e+00> : vector<16x8xf32>
    %63 = tpu.matmul %51, %17, %cst_29 {dimension_numbers = #tpu.dot_dimension_numbers<[1], [0], [0], [1], [0, 0, 1, 1], [], []>} : vector<16x16xbf16>, vector<16x8xbf16>, vector<16x8xf32> -> vector<16x8xf32>
    %64 = arith.addf %62, %63 : vector<16x8xf32>
    %c0_30 = arith.constant 0 : index
    %c1_31 = arith.constant 1 : index
    %c1_32 = arith.constant 1 : index
    %c0_33 = arith.constant 0 : index
    %c0_34 = arith.constant 0 : index
    %65 = vector.load %arg3[%c0_30, %c1_31, %c1_32, %c0_33, %c0_34] : memref<1x2x2x16x8xf32, #tpu.memory_space<vmem>>, vector<1x1x1x16x8xf32>
    %66 = vector.shape_cast %65 : vector<1x1x1x16x8xf32> to vector<16x8xf32>
    %67 = vector.shape_cast %64 : vector<16x8xf32> to vector<1x1x1x16x8xf32>
    tpu.vector_store %arg3[%c0_30, %c1_31, %c1_32, %c0_33, %c0_34], %67 {strides = array<i32>} : memref<1x2x2x16x8xf32, #tpu.memory_space<vmem>>, vector<1x1x1x16x8xf32>,
    return
  }
  func.func @transform_0(%arg0: i32, %arg1: i32) -> (i32, i32, i32) {
    %c0_i32 = arith.constant 0 : i32
    %c0_i32_0 = arith.constant 0 : i32
    return %arg0, %arg1, %c0_i32 : i32, i32, i32
  }
  func.func @transform_1(%arg0: i32, %arg1: i32) -> (i32, i32, i32, i32, i32) {
    %c0_i32 = arith.constant 0 : i32
    %c0_i32_0 = arith.constant 0 : i32
    %c0_i32_1 = arith.constant 0 : i32
    %c0_i32_2 = arith.constant 0 : i32
    return %arg0, %c0_i32, %c0_i32_0, %arg1, %c0_i32_1 : i32, i32, i32, i32, i32
  }
}

</mosaic_0001>

<bundles_post_ra>
// kernel: tpu_custom_call.1
= control target key start
LH: loop header
LB: loop body
LE: loop exit
PB: predicated region body
PF: predicated region fallthrough
CT: control target
= control target key end

     0   :  { %6 = vsyncpa [#allocation3], 0  ;;  %s1545_s0 = inlined_call_operand.hbm [shape: f32[2,32,32], index: 0, kind: input, shape index: {}]   ;;  %s1546_s1 = inlined_call_operand.vmem [shape: f32[2,2,2,32,8], index: 1, kind: output, shape index: {}]  }
   0x1   :  { %8 = vsyncpa [#allocation3 + $0x1], 0  ;;  %s1273_s6 = smov 0   ;;  %s1275_s7 = smov 0  }
   0x2   :  { %s1277_s8 = smov 0   ;;  %s1279_s9 = smov 0  }
   0x3   :  { %s1281_s10 = smov 0   ;;  %s1283_s11 = smov 0  }
   0x4   :  { %s1285_s12 = smov 0   ;;  %s1287_s13 = smov 0  }
   0x5 LB: > { %s890_s14 = sadd.s32 4294967295, %s1254_s13   ;;  %s23_s15 = sadd.s32 1, %s1246_s11  ;;  %s1254_s13 = sphi %s1287_s13, %s14_s13   ;;  %s1250_s12 = sphi %s1285_s12, %s1563_s12   ;;  %s1246_s11 = sphi %s1283_s11, %s1562_s11   ;;  %s1242_s10 = sphi %s1281_s10, %s1561_s10   ;;  %s1238_s9 = sphi %s1279_s9, %s1560_s9   ;;  %s1234_s8 = sphi %s1277_s8, %s1559_s8   ;;  %s1230_s7 = sphi %s1275_s7, %s1558_s7   ;;  %s1226_s6 = sphi %s1273_s6, %s1557_s6  }
   0x6   : > { %p24_p0 = scmp.ge.s32.totalorder %s23_s15, 2  ;;  %s26_s16 = sadd.s32 1, %s1250_s12 }
   0x7   : > { %s35_s17 = sadd.s32 1, %s1234_s8  ;;  %p42_p1 = scmp.ne.s32.totalorder %s1234_s8, %s1230_s7 }
   0x8   : > { %s1565_s15 = smov (%p24_p0, %s23_s15), 0  ;;  %s1567_s16 = smov (!%p24_p0, %s26_s16), %s1250_s12 }
   0x9   : > { %s31_s18 = ssub.s32 %s1246_s11, %s1565_s15  ;;  %p43_p2 = scmp.eq.s32.totalorder %s1254_s13, 0 }
   0xa   : > { %p28_p3 = scmp.ge.s32.totalorder %s1567_s16, 2  ;;  %p48_p4 = scmp.ne.s32.totalorder %s1230_s7, %s1226_s6 }
   0xb   : > { %p1327_p5 = por %p43_p2, %p42_p1  ;;  %p49_p6 = scmp.eq.s32.totalorder %s890_s14, 0 }
   0xc   : > { %s1569_s16 = smov (%p28_p3, %s1567_s16), 0  ;;  %p74_p8 = scmp.eq.s32.totalorder %s890_s14, 3 }
   0xd   : > { %p1333_p7 = por %p49_p6, %p48_p4  ;;  %s30_s21 = ssub.s32 %s1250_s12, %s1569_s16 }
   0xe   : > { %s32_s22 = sor.u32 %s31_s18, %s30_s21  ;;  %p1342_p9 = por %p74_p8, %p42_p1 }
   0xf   : > { %p33_p10 = scmp.eq.s32.totalorder %s32_s22, 0  ;;  %p1087_p11 = scmp.lt.s32.totalorder %s1254_s13, 4 }
  0x10   : > { %s1549_s23 = scalar_select %p1342_p9, 1, 0 }
  0x11   : > { %s100_s24 = sand.u32 1, %s1234_s8   ;;  %s895_s25 = sshll.u32 %s1246_s11, 1 }
  0x12   : > { %s1350_s26 = scalar_select %p33_p10, %s1234_s8, %s35_s17  }
  0x13   : > { %s894_s27 = sshll.u32 %s100_s24, 4  ;;  %s896_s28 = sshll.u32 %s1250_s12, 2 }
  0x14   : > { %s110_s29 = sadd.s32 %s896_s28, %s895_s25  ;;  %s104_s30 = scalar_lea.vmem [#allocation2], %s894_s27 }
  0x15   : > { %s113_s2 = sshll.u32 %s104_s30, 4  ;;  %s897_s3 = sshll.u32 %s110_s29, 7  ;;  %s1353_s2 = int_to_ptr.vmem [resolvable:$true] %s113_s2 }
  0x16   : > { %s1358_s6 = scalar_lea.hbm %s1545_s0, %s897_s3  ;;  %p1362_p12 = pnand %p1087_p11, %p1327_p5 }
  0x17   : > { %s1367_s17 = scalar_lea.sflag [#allocation3], %s100_s24  ;;  %s1158_s18 = scalar_lea.hbm %s1358_s6, 256 }
  0x18   : > { %p1159_p0 = scmp.ne.s32.totalorder %s1358_s6, %s1158_s18  ;;  %p1160_p1 = pneg %p1362_p12 }
  0x19   : > { %s1163_s22 = scalar_lea.hbm %s1545_s0, 1024  ;;  %p1164_p4 = scmp.lt.u32.totalorder %s1358_s6, %s1545_s0 }
  0x1a   : > { %p1161_p2 = pnand %p1160_p1, %p1159_p0  ;;  %p1165_p5 = scmp.lt.u32.totalorder %s1163_s22, %s1158_s18 }
  0x1b   : > { %p1167_p8 = scmp.lt.u32.totalorder %s1158_s18, %s1358_s6 }
  0x1c   : > { %p1162_p3 = pneg %p1161_p2  ;;  %p1166_p6 = por %p1165_p5, %p1164_p4 }
  0x1e   : > { %p1168_p10 = por %p1167_p8, %p1166_p6 }
  0x20   : > { %p1169_p11 = pnand %p1168_p10, %p1162_p3 }
  0x22   : > { %1172 = shalt.err (!%p1169_p11)
}
  0x23   : > { %s1173_s24 = scalar_lea.vmem %s1353_s2, 256  ;;  %s1256_s28 = smov [#allocation2]  }
  0x24   : > { %p1174_p0 = scmp.ne.s32.totalorder %s1353_s2, %s1173_s24  ;;  %s1178_s29 = sshll.u32 %s1256_s28, 4  ;;  %s1179_s29 = int_to_ptr.vmem [resolvable:$false] %s1178_s29 }
  0x25   : > { %s1180_s30 = scalar_lea.vmem %s1179_s29, 512  ;;  %p1181_p9 = scmp.lt.s32.totalorder %s1353_s2, %s1179_s29 }
  0x26   : > { %p1176_p2 = pnand %p1174_p0, %p1160_p1  ;;  %p1182_p4 = scmp.lt.s32.totalorder %s1180_s30, %s1173_s24 }
  0x28   : > { %p1177_p13 = pneg %p1176_p2  ;;  %p1183_p5 = por %p1182_p4, %p1181_p9 }
  0x2a   : > { %p1184_p6 = pnand %p1183_p5, %p1177_p13 }
  0x2c   : > { %1187 = shalt.err (!%p1184_p6)
}
  0x2d   : > { %s1257_s3 = smov 128   ;;  %s1258_s4 = smov 8  }
  0x2e   : > { %1086 = dma.hbm_to_vmem [thread:$0]  (!%p1362_p12), %s1358_s6, 256, %s1353_s2, %s1367_s17, %s1257_s3, %s1257_s3, %s1258_s4  }
  0x2f   : > { %p121_p1 = scmp.lt.s32.totalorder %s1254_s13, 5  ;;  %p1551_p3 = scmp.ge.s32.totalorder %s1254_s13, 1 }
  0x31   : > { %p122_p8 = pnand %p1551_p3, %p121_p1 }
  0x32   : > { %s1399_s5 = sand.u32 (!%p122_p8), 1, %s1230_s7  }
  0x33   : > { %125 = sbr.rel (%p122_p8) target bundleno = 430 (0x1ae), region = 24  ;;  %s899_s18 = sshll.u32 (!%p122_p8), %s1399_s5, 4 }
  0x34   : > { %s128_s19 = scalar_lea.sflag (!%p122_p8), [#allocation3], %s1399_s5  ;;  %s131_s21 = scalar_lea.vmem (!%p122_p8), [#allocation2], %s899_s18 }
  0x3a   : > { %1221 = dma.done.wait (%p1333_p7), %s128_s19, 256  }
  0x3b   : > { %1223 = vsyncadd (%p1333_p7), %s128_s19, 4294967040  ;;  %v152_v0 = vlaneseq  ;;  %v1259_v1 = vmov 0.0   ;;  %vm1260_vm0 = vmmov 0   ;;  %v452_v7 = vld [vmem:[%s131_s21] sm:$0xff]  ;;  %v453_v8 = vld [vmem:[%s131_s21 + $0x8] sm:$0xff]  ;;  %vm186_vm7 = vcmask 130048  }
  0x3c   : > { %977 = vmatprep.subr.bf16.mxu0 %v1259_v1  ;;  %995 = vmatprep.subr.bf16.mxu1 %v1259_v1  ;;  %v454_v10 = vpack.c.bf16 %v453_v8, %v452_v7  ;;  %v1261_v11 = vmov 1.0|1.0   ;;  %s1262_s20 = smov 112   ;;  %s900_s2 = sshll.u32 %s1399_s5, 6  ;;  %vm321_vm8 = vcmask 64512  }
  0x3d   : > { %v153_v2 = vshrl.u32 %v152_v0, 7  ;;  %v156_v3 = vand.u32 127, %v152_v0  ;;  %979 = vmatprep.mubr.msk.bf16.mxu0 %vm1260_vm0, %v1259_v1  ;;  %997 = vmatprep.mubr.msk.bf16.mxu1 %vm1260_vm0, %v1259_v1  ;;  %s1488_s6 = scalar_lea.vmem [#allocation4], %s900_s2  ;;  %p1556_p7 = scmp.ne.s32.totalorder %s1549_s23, 0 }
  0x3e   : > { %v455_v13 = vunpack.c.l.bf16 %v454_v10  ;;  %v456_v14 = vunpack.c.h.bf16 %v454_v10  ;;  %s948_s14 = sshll.u32 (%p1556_p7), %s1238_s9, 1  ;;  %s949_s17 = sshll.u32 (%p1556_p7), %s1242_s10, 4 }
  0x3f   : > { %v154_v4 = vadd.s32 8, %v153_v2  ;;  %v157_v5 = vmul.u32 2, %v156_v3  ;;  %s748_s22 = sadd.s32 (%p1556_p7), %s949_s17, %s948_s14 }
  0x40   : > { %v457_v15 = vsub.f32 %v452_v7, %v455_v13  ;;  %v458_v16 = vsub.f32 %v453_v8, %v456_v14  ;;  %s950_s23 = sshll.u32 (%p1556_p7), %s748_s22, 3 }
  0x41   : > { %vm158_vm1 = vcmp.eq.s32.totalorder %v153_v2, %v157_v5  ;;  %vm159_vm2 = vcmp.eq.s32.totalorder %v154_v4, %v157_v5  ;;  %v165_v6 = vadd.s32 1, %v157_v5  ;;  %s750_s24 = scalar_lea.vmem (%p1556_p7), %s1546_s1, %s950_s23 }
  0x42   : > { %vm1413_vm3 = vmpackc.low %vm159_vm2, %vm158_vm1  ;;  %v459_v17 = vpack.c.bf16 %v458_v16, %v457_v15 }
  0x43   : > { %978 = vmatpush3.bf16.msk.msra.mxu0 %vm1413_vm3, %v1261_v11  ;;  %vm166_vm4 = vcmp.eq.s32.totalorder %v153_v2, %v165_v6  ;;  %vm167_vm5 = vcmp.eq.s32.totalorder %v154_v4, %v165_v6 }
  0x44   : > { %vm1419_vm6 = vmpackc.low %vm167_vm5, %vm166_vm4  ;;  %983 = vmatprep.subr.bf16.mxu0 %v1259_v1  ;;  %466 = vrot.lane.b32.xlu0 %v459_v17, %s1262_s20  ;;  %v460_v18 = vunpack.c.l.bf16 %v459_v17  ;;  %v461_v19 = vunpack.c.h.bf16 %v459_v17 }
  0x45   : > { %996 = vmatpush3.bf16.msk.msra.mxu1 %vm1419_vm6, %v1261_v11 }
  0x46   : > { %1001 = vmatprep.subr.bf16.mxu1 %v1259_v1  ;;  %980 = vmatmul.mubr.msk.bf16.vlgmr.msra.gmra.mrb[0].mxu0 %vm186_vm7, %v459_v17  ;;  %v462_v20 = vsub.f32 %v457_v15, %v460_v18  ;;  %v463_v21 = vsub.f32 %v458_v16, %v461_v19 }
  0x47   : > { %984 = vmatpush3.bf16.msk.msra.mxu0 %vm1413_vm3, %v1261_v11  ;;  %985 = vmatprep.mubr.msk.bf16.mxu0 %vm1260_vm0, %v1259_v1 }
  0x48   : > { %998 = vmatmul.mubr.msk.bf16.vlgmr.msra.gmra.mrb[0].mxu1 %vm186_vm7, %v459_v17  ;;  %989 = vmatprep.subr.bf16.mxu0 %v1259_v1  ;;  %v464_v22 = vpack.c.bf16 %v463_v21, %v462_v20 }
  0x49   : > { %1002 = vmatpush3.bf16.msk.msra.mxu1 %vm1419_vm6, %v1261_v11  ;;  %1003 = vmatprep.mubr.msk.bf16.mxu1 %vm1260_vm0, %v1259_v1 }
  0x4a   : > { %513 = vrot.lane.b32.xlu0 %v454_v10, %s1262_s20  ;;  %1007 = vmatprep.subr.bf16.mxu1 %v1259_v1 }
  0x4b   : > { %560 = vrot.lane.b32.xlu1 %v464_v22, %s1262_s20 }
  0x52   : > { %986 = vmatmul.mubr.msk.bf16.vlgmr.msra.gmra.mrb[0].mxu0 %vm186_vm7, %v454_v10 }
  0x53   : > { %990 = vmatpush3.bf16.msk.msra.mxu0 %vm1413_vm3, %v1261_v11  ;;  %991 = vmatprep.mubr.msk.bf16.mxu0 %vm1260_vm0, %v1259_v1 }
  0x54   : > { %1004 = vmatmul.mubr.msk.bf16.vlgmr.msra.gmra.mrb[0].mxu1 %vm186_vm7, %v454_v10  ;;  %1013 = vmatprep.subr.bf16.mxu0 %v1259_v1 }
  0x55   : > { %1008 = vmatpush3.bf16.msk.msra.mxu1 %vm1419_vm6, %v1261_v11  ;;  %1009 = vmatprep.mubr.msk.bf16.mxu1 %vm1260_vm0, %v1259_v1 }
  0x56   : > { %1031 = vmatprep.subr.bf16.mxu1 %v1259_v1 }
  0x5e   : > { %992 = vmatmul.mubr.msk.bf16.vlgmr.msra.gmra.mrb[0].mxu0 %vm186_vm7, %v464_v22 }
  0x5f   : > { %1014 = vmatpush3.bf16.msk.msra.mxu0 %vm1413_vm3, %v1261_v11  ;;  %1015 = vmatprep.mubr.msk.bf16.mxu0 %vm1260_vm0, %v1259_v1 }
  0x60   : > { %1010 = vmatmul.mubr.msk.bf16.vlgmr.msra.gmra.mrb[0].mxu1 %vm186_vm7, %v464_v22  ;;  %1019 = vmatprep.subr.bf16.mxu0 %v1259_v1 }
  0x61   : > { %1032 = vmatpush3.bf16.msk.msra.mxu1 %vm1419_vm6, %v1261_v11  ;;  %1033 = vmatprep.mubr.msk.bf16.mxu1 %vm1260_vm0, %v1259_v1 }
  0x62   : > { %1037 = vmatprep.subr.bf16.mxu1 %v1259_v1 }
  0xb6   : > { %v467_v23 = vpop.permute.xlu0 %466 }
  0xb7   : > { %1016 = vmatmul.mubr.msk.bf16.vlgmr.msra.gmra.mrb[4].mxu0 %vm186_vm7, %v467_v23  ;;  %1034 = vmatmul.mubr.msk.bf16.vlgmr.msra.gmra.mrb[4].mxu1 %vm186_vm7, %v467_v23 }
  0xb8   : > { %1020 = vmatpush3.bf16.msk.msra.mxu0 %vm1413_vm3, %v1261_v11  ;;  %1038 = vmatpush3.bf16.msk.msra.mxu1 %vm1419_vm6, %v1261_v11 }
  0xb9   : > { %1021 = vmatprep.mubr.msk.bf16.mxu0 %vm1260_vm0, %v1259_v1  ;;  %1025 = vmatprep.subr.bf16.mxu0 %v1259_v1 }
  0xba   : > { %1039 = vmatprep.mubr.msk.bf16.mxu1 %vm1260_vm0, %v1259_v1  ;;  %1043 = vmatprep.subr.bf16.mxu1 %v1259_v1 }
  0xbc   : > { %v514_v24 = vpop.permute.xlu0 %513 }
  0xbd   : > { %v561_v25 = vpop.permute.xlu1 %560 }
  0xc3   : > { %1022 = vmatmul.mubr.msk.bf16.vlgmr.msra.gmra.mrb[4].mxu0 %vm186_vm7, %v514_v24  ;;  %1040 = vmatmul.mubr.msk.bf16.vlgmr.msra.gmra.mrb[4].mxu1 %vm186_vm7, %v514_v24 }
  0xc4   : > { %1026 = vmatpush3.bf16.msk.msra.mxu0 %vm1413_vm3, %v1261_v11  ;;  %1044 = vmatpush3.bf16.msk.msra.mxu1 %vm1419_vm6, %v1261_v11 }
  0xc5   : > { %1027 = vmatprep.mubr.msk.bf16.mxu0 %vm1260_vm0, %v1259_v1  ;;  %1045 = vmatprep.mubr.msk.bf16.mxu1 %vm1260_vm0, %v1259_v1 }
  0xcf   : > { %1028 = vmatmul.mubr.msk.bf16.vlgmr.msra.gmra.mrb[4].mxu0 %vm186_vm7, %v561_v25  ;;  %1046 = vmatmul.mubr.msk.bf16.vlgmr.msra.gmra.mrb[4].mxu1 %vm186_vm7, %v561_v25 }
 0x131   : > { %v312_v26 = vpop.f32.mrb[0].mxu0 }
 0x132   : > { %322 = vst.msk [vmem:[%s1488_s6] sm:$0xff] %vm321_vm8, %v312_v26  ;;  %v993_v28 = vpop.f32.mrb[1].mxu0 }
 0x133   : > { %v440_v27 = vpop.f32.mrb[0].mxu1  ;;  %v315_v30 = vpop.f32.mrb[2].mxu0 }
 0x134   : > { %923 = vst.msk [vmem:[%s1488_s6 + $0x10] sm:$0xff] %vm321_vm8, %v440_v27  ;;  %v1011_v29 = vpop.f32.mrb[1].mxu1  ;;  %323 = vst.msk [vmem:[%s1488_s6 + $0x8] sm:$0xff] %vm321_vm8, %v315_v30  ;;  %v994_v32 = vpop.f32.mrb[3].mxu0 }
 0x135   : > { %v443_v31 = vpop.f32.mrb[2].mxu1 }
 0x136   : > { %924 = vst.msk [vmem:[%s1488_s6 + $0x18] sm:$0xff] %vm321_vm8, %v443_v31  ;;  %v1012_v33 = vpop.f32.mrb[3].mxu1 }
 0x139   : > { %v792_v42 = vld [vmem:[%s1488_s6] sm:$0xff] (%p1556_p7) }
 0x13a   : > { %793 = vst [vmem:[%s750_s24] sm:$0xff] (%p1556_p7), %v792_v42 }
 0x13b   : > { %v794_v43 = vld [vmem:[%s1488_s6 + $0x8] sm:$0xff] (%p1556_p7)  ;;  %v796_v44 = vld [vmem:[%s1488_s6 + $0x10] sm:$0xff] (%p1556_p7) }
 0x13c   : > { %795 = vst [vmem:[%s750_s24 + $0x8] sm:$0xff] (%p1556_p7), %v794_v43  ;;  %797 = vst [vmem:[%s750_s24 + $0x20] sm:$0xff] (%p1556_p7), %v796_v44 }
 0x13d   : > { %v798_v45 = vld [vmem:[%s1488_s6 + $0x18] sm:$0xff] (%p1556_p7) }
 0x13e   : > { %799 = vst [vmem:[%s750_s24 + $0x28] sm:$0xff] (%p1556_p7), %v798_v45 }
 0x19f   : > { %745 = sbr.rel (!%p1556_p7) target bundleno = 430 (0x1ae), region = 32 }
 0x1a2   : > { %v599_v34 = vpop.f32.mrb[4].mxu0  ;;  %v727_v35 = vpop.f32.mrb[4].mxu1 }
 0x1a3   : > { %934 = vst.msk [vmem:[%s1488_s6 + $0x20] sm:$0xff] %vm321_vm8, %v599_v34  ;;  %945 = vst.msk [vmem:[%s1488_s6 + $0x30] sm:$0xff] %vm321_vm8, %v727_v35  ;;  %v1029_v36 = vpop.f32.mrb[5].mxu0  ;;  %v1047_v37 = vpop.f32.mrb[5].mxu1 }
 0x1a4   : > { %v602_v38 = vpop.f32.mrb[6].mxu0  ;;  %v730_v39 = vpop.f32.mrb[6].mxu1 }
 0x1a5   : > { %935 = vst.msk [vmem:[%s1488_s6 + $0x28] sm:$0xff] %vm321_vm8, %v602_v38  ;;  %946 = vst.msk [vmem:[%s1488_s6 + $0x38] sm:$0xff] %vm321_vm8, %v730_v39  ;;  %v1030_v40 = vpop.f32.mrb[7].mxu0  ;;  %v1048_v41 = vpop.f32.mrb[7].mxu1 }
 0x1aa   : > { %v800_v46 = vld [vmem:[%s1488_s6 + $0x20] sm:$0xff]  ;;  %v804_v48 = vld [vmem:[%s1488_s6 + $0x30] sm:$0xff] }
 0x1ab   : > { %801 = vst [vmem:[%s750_s24 + $0x40] sm:$0xff] %v800_v46  ;;  %805 = vst [vmem:[%s750_s24 + $0x60] sm:$0xff] %v804_v48 }
 0x1ac   : > { %v802_v47 = vld [vmem:[%s1488_s6 + $0x28] sm:$0xff]  ;;  %v806_v49 = vld [vmem:[%s1488_s6 + $0x38] sm:$0xff] }
 0x1ad   : > { %803 = vst [vmem:[%s750_s24 + $0x48] sm:$0xff] %v802_v47  ;;  %807 = vst [vmem:[%s750_s24 + $0x68] sm:$0xff] %v806_v49 }
 0x1ae PF: > { %s14_s13 = sadd.s32 1, %s1254_s13   ;;  %s1557_s6 = smov %s1230_s7 }
 0x1af   : > { %p11_p9 = scmp.ge.s32.totalorder %s14_s13, 6   ;;  %s1558_s7 = smov %s1234_s8 }
 0x1b0   : > { %s1559_s8 = smov %s1350_s26  ;;  %s1560_s9 = smov %s1246_s11 }
 0x1b1   : > { %s1561_s10 = smov %s1250_s12  ;;  %s1562_s11 = smov %s1565_s15 }
 0x1b2   : > { %s1563_s12 = smov %s1569_s16  ;;  %13 = sbr.rel (!%p11_p9) target bundleno = 5 (0x5), region = 105 }
 0x1b9   :  { %823 = vsyncpa [#allocation3], 1 }
 0x1ba   :  { %825 = vsyncpa [#allocation3 + $0x1], 1 }

</bundles_post_ra>
